<compile_context>
chip_gen: v7x
topology: tpu7x:2x2x1
jax: 0.10.0
libtpu: 0.0.40
codegen_flags: <defaults>
</compile_context>

<pallas_src>
import jax
import jax.numpy as jnp
from jax.experimental import pallas as pl
from jax.experimental.pallas import tpu as pltpu


def _copy_kernel(x_ref, o_ref):
    # Pure lane-dense block copy; the flatten already happened (free reshape)
    # in the wrapper.  The kernel just streams bytes at HBM roofline.
    o_ref[...] = x_ref[...]


# Minimum sublane multiple for the second-to-last block dim, per element size.
_SUBLANE = {1: 32, 2: 16, 4: 8, 8: 8}

# Only force a second grid step (megacore split) when the copy is big enough
# for the extra ~0.35 us per-step overhead to be worth it.
_MEGACORE_SPLIT_BYTES = 4 * 1024 * 1024


def _device_budget():
    """Return (max_block_bytes, vmem_limit_bytes) tuned per TPU generation."""
    vmem = None
    try:
        info = pltpu.get_tpu_info()
        vmem = getattr(info, "vmem_capacity_bytes", None)
    except Exception:
        vmem = None
    if vmem is None:
        # Conservative: 2 MiB blocks -> 2 pipeline bufs x (in + out) = 8 MiB,
        # fits every generation's default scoped-VMEM limit untouched.
        return 2 * 1024 * 1024, None
    if vmem >= 128 * 1024 * 1024:        # v5e / v6e: 128 MiB physical VMEM
        return 8 * 1024 * 1024, 96 * 1024 * 1024
    if vmem >= 64 * 1024 * 1024:         # v7x: 64 MiB per TensorCore
        return 6 * 1024 * 1024, 48 * 1024 * 1024
    return 2 * 1024 * 1024, None


def flatten(x, *, max_block_bytes=None, vmem_limit_bytes=None):
    """Pallas equivalent of torch Flatten: x.view(x.size(0), -1)."""
    B = x.shape[0]
    out_dim = 1
    for d in x.shape[1:]:
        out_dim *= d

    # Zero-cost metadata reshape (contiguous row-major == torch .view(B, -1)).
    x2 = jnp.reshape(x, (B, out_dim))

    if max_block_bytes is None:
        dev_blk, dev_limit = _device_budget()
        max_block_bytes = dev_blk
        if vmem_limit_bytes is None:
            vmem_limit_bytes = dev_limit

    itemsize = jnp.dtype(x.dtype).itemsize
    sub = _SUBLANE.get(itemsize, 8)
    row_bytes = out_dim * itemsize
    total_bytes = B * row_bytes

    def _call(arr, grid, block, index_map, dims):
        cp_kwargs = dict(dimension_semantics=dims)
        if vmem_limit_bytes is not None:
            cp_kwargs["vmem_limit_bytes"] = vmem_limit_bytes
        return pl.pallas_call(
            _copy_kernel,
            out_shape=jax.ShapeDtypeStruct(arr.shape, arr.dtype),
            grid=grid,
            in_specs=[pl.BlockSpec(block, index_map)],
            out_specs=pl.BlockSpec(block, index_map),
            # Flatten is metadata-only: alias in->out so no fresh HBM output
            # buffer is needed when the input can be donated.
            input_output_aliases={0: 0},
            compiler_params=pltpu.CompilerParams(**cp_kwargs),
        )(arr)

    # Narrow-feature guard: out_dim < 128 would leave the lane dim mostly
    # masked (vst.msk partial stores).  Fold batch into lanes, copy one
    # lane-dense row, reshape back (free).
    if out_dim < 128:
        flat = jnp.reshape(x2, (1, B * out_dim))
        y = _call(flat, (1,), (1, B * out_dim), lambda i: (0, 0), ("arbitrary",))
        return jnp.reshape(y, (B, out_dim))

    if row_bytes > max_block_bytes:
        # A single flattened row exceeds the per-buffer budget: tile the lane
        # dimension too (multiple of 128) so blocks stay within VMEM on all
        # generations (fatal soonest on v7x's 64 MiB).
        bt = B if B < sub else sub
        lane_budget = max(128, max_block_bytes // max(bt * itemsize, 1))
        lane_tile = max(128, (lane_budget // 128) * 128)
        lane_tile = min(lane_tile, out_dim)
        grid = (pl.cdiv(B, bt), pl.cdiv(out_dim, lane_tile))
        return _call(x2, grid, (bt, lane_tile), lambda i, j: (i, j),
                     ("parallel", "parallel"))

    # Whole rows fit in a block: tile over the batch only.
    bt = max(1, max_block_bytes // row_bytes)
    if bt >= B:
        bt = B
        # Megacore: keep >= 2 grid steps on large copies so both v7x
        # TensorCores get work (no effect on tiny inputs or single-TC chips).
        if total_bytes >= _MEGACORE_SPLIT_BYTES and B >= 2 * sub:
            half = pl.cdiv(B, 2)
            bt = ((half + sub - 1) // sub) * sub
            if bt >= B:
                bt = B
    else:
        bt = max(sub, (bt // sub) * sub)
        bt = min(bt, B)

    grid = (pl.cdiv(B, bt),)
    return _call(x2, grid, (bt, out_dim), lambda i: (i, 0), ("parallel",))


if __name__ == "__main__":
    key = jax.random.PRNGKey(0)
    # Small NCHW input consistent with a conv-net feature map: B=2, C=4, 16x16.
    x = jax.random.normal(key, (2, 4, 16, 16), dtype=jnp.float32)

    y = flatten(x)
    jax.block_until_ready(y)

    # Reference: torch x.view(B, -1) on contiguous NCHW == row-major reshape.
    ref = jnp.reshape(x, (x.shape[0], -1))

    assert y.shape == ref.shape, (y.shape, ref.shape)
    assert y.dtype == ref.dtype, (y.dtype, ref.dtype)
    # Bit-exact check (pure copy — allclose could mask layout bugs).
    assert bool(jnp.array_equal(y, ref)), "Pallas flatten does not match reference"

    print("KERNEL_OK")
</pallas_src>

<mosaic_0001>
module attributes {stable_mosaic.version = 11 : i64} {
  func.func @_copy_kernel(%arg0: i32, %arg1: memref<2x1024xf32, #tpu.memory_space<vmem>>, %arg2: memref<2x1024xf32, #tpu.memory_space<vmem>>) attributes {dimension_semantics = [#tpu.dimension_semantics<parallel>], iteration_bounds = array<i64: 1>, scalar_prefetch = 0 : i64, scratch_operands = 0 : i64, tpu.core_type = #tpu.core_type<tc>, window_params = [{transform_indices = @transform_0, window_bounds = array<i64: 2, 1024>}, {transform_indices = @transform_1, window_bounds = array<i64: 2, 1024>}]} {
    %c0 = arith.constant 0 : index
    %c0_0 = arith.constant 0 : index
    %0 = vector.load %arg1[%c0, %c0_0] : memref<2x1024xf32, #tpu.memory_space<vmem>>, vector<2x1024xf32>
    %c0_1 = arith.constant 0 : index
    %c0_2 = arith.constant 0 : index
    %1 = vector.load %arg2[%c0_1, %c0_2] : memref<2x1024xf32, #tpu.memory_space<vmem>>, vector<2x1024xf32>
    tpu.vector_store %arg2[%c0_1, %c0_2], %0 {strides = array<i32>} : memref<2x1024xf32, #tpu.memory_space<vmem>>, vector<2x1024xf32>,
    return
  }
  func.func @transform_0(%arg0: i32) -> (i32, i32) {
    %c0_i32 = arith.constant 0 : i32
    %c0_i32_0 = arith.constant 0 : i32
    return %arg0, %c0_i32 : i32, i32
  }
  func.func @transform_1(%arg0: i32) -> (i32, i32) {
    %c0_i32 = arith.constant 0 : i32
    %c0_i32_0 = arith.constant 0 : i32
    return %arg0, %c0_i32 : i32, i32
  }
}

</mosaic_0001>

<bundles_post_ra>
// kernel: tpu_custom_call.1
= control target key start
LH: loop header
LB: loop body
LE: loop exit
PB: predicated region body
PF: predicated region fallthrough
CT: control target
= control target key end

     0   :  { %6 = vsyncpa [#allocation3], 0  ;;  %s126_s0 = inlined_call_operand.hbm [shape: f32[2,1024], index: 0, kind: input, shape index: {}, may-alias: {0,1}]   ;;  %s127_s1 = inlined_call_operand.hbm [shape: f32[2,1024], index: 1, kind: output, shape index: {}, may-alias: {0,1}]  }
   0x1   :  { %7 = vsyncpa [#allocation4], 0  ;;  %s90_s6 = smov [#allocation2]   ;;  %s42_s10 = scalar_lea.hbm %s126_s0, 256 }
   0x2   :  { %s14_s7 = sshll.u32 %s90_s6, 4  ;;  %p43_p0 = scmp.ne.s32.totalorder %s126_s0, %s42_s10  ;;  %s15_s7 = int_to_ptr.vmem [resolvable:$true] %s14_s7 }
   0x3   :  { %p46_p1 = scmp.lt.u32.totalorder %s42_s10, %s126_s0 }
   0x5   :  { %p48_p2 = pnand %p46_p1, %p43_p0 }
   0x7   :  { %51 = shalt.err (!%p48_p2)
}
   0x8   :  { %s52_s15 = scalar_lea.vmem %s15_s7, 256  ;;  %p57_p4 = scmp.lt.s32.totalorder %s15_s7, %s15_s7 }
   0x9   :  { %p53_p3 = scmp.ne.s32.totalorder %s15_s7, %s52_s15  ;;  %p58_p5 = scmp.lt.s32.totalorder %s52_s15, %s52_s15 }
   0xb   :  { %p59_p6 = por %p58_p5, %p57_p4 }
   0xd   :  { %p60_p7 = pnand %p59_p6, %p53_p3 }
   0xf   :  { %63 = shalt.err (!%p60_p7)
}
  0x10   :  { %17 = dma.hbm_to_vmem [thread:$0]  %s126_s0, 256, %s15_s7, [#allocation3]  }
  0x11   :  { %86 = dma.done.wait [#allocation3], 256  }
  0x12   :  { %87 = vsyncadd [#allocation3], 4294967040  ;;  %s91_s18 = smov [#allocation5]   ;;  %v21_v0 = vld [vmem:[#allocation2] sm:$0xff]  ;;  %v22_v1 = vld [vmem:[#allocation2 + $0x8] sm:$0xff] }
  0x13   :  { %s31_s19 = sshll.u32 %s91_s18, 4  ;;  %23 = vst [vmem:[#allocation5] sm:$0xff] %v21_v0  ;;  %24 = vst [vmem:[#allocation5 + $0x8] sm:$0xff] %v22_v1  ;;  %s32_s19 = int_to_ptr.vmem [resolvable:$true] %s31_s19 }
  0x14   :  { %s64_s20 = scalar_lea.vmem %s32_s19, 256  ;;  %p69_p9 = scmp.lt.s32.totalorder %s32_s19, %s32_s19 }
  0x15   :  { %p65_p8 = scmp.ne.s32.totalorder %s32_s19, %s64_s20  ;;  %p70_p10 = scmp.lt.s32.totalorder %s64_s20, %s64_s20 }
  0x17   :  { %p71_p11 = por %p70_p10, %p69_p9 }
  0x19   :  { %p72_p12 = pnand %p71_p11, %p65_p8 }
  0x1b   :  { %75 = shalt.err (!%p72_p12)
}
  0x1c   :  { %s76_s0 = scalar_lea.hbm %s127_s1, 256 }
  0x1d   :  { %p77_p13 = scmp.ne.s32.totalorder %s127_s1, %s76_s0  ;;  %p80_p0 = scmp.lt.u32.totalorder %s76_s0, %s127_s1 }
  0x1f   :  { %p82_p1 = pnand %p80_p0, %p77_p13 }
  0x21   :  { %85 = shalt.err (!%p82_p1)
}
  0x22   :  { %34 = dma.vmem_to_hbm [thread:$0]  %s32_s19, 256, %s127_s1, [#allocation4]  }
  0x23   :  { %88 = dma.done.wait [#allocation4], 256  }
  0x24   :  { %89 = vsyncadd [#allocation4], 4294967040 }
  0x25   :  { %38 = vsyncpa [#allocation3], 1 }
  0x26   :  { %39 = vsyncpa [#allocation4], 1 }

</bundles_post_ra>
